<compile_context>
chip_gen: v7x
topology: tpu7x:2x2x1
jax: 0.10.0
libtpu: 0.0.40
codegen_flags: <defaults>
</compile_context>

<pallas_src>
import functools

import jax
import jax.numpy as jnp
from jax import lax
from jax.experimental import pallas as pl
from jax.experimental.pallas import tpu as pltpu

_MIB = 1024 * 1024


def _style_single_block_kernel(x_ref, o_ref):
    """One batch element, entire (C, H*W) spatial extent resident in VMEM."""
    x = x_ref[...].astype(jnp.float32)                         # (C, HW)
    pooled = jnp.sum(x, axis=-1, keepdims=True)                # (C, 1); 1/HW cancels
    sq_sum = jnp.sum(pooled * pooled, axis=0, keepdims=True)   # (1, 1)
    # No epsilon: matches the reference `style / sum(style**2)**0.5`.
    o_ref[...] = (pooled * lax.rsqrt(sq_sum)).astype(o_ref.dtype)


def _style_tiled_kernel(x_ref, o_ref, acc_ref, *, hw_total, thw, needs_mask):
    """Streamed reduction over H*W tiles with a folded (C, 128) accumulator."""
    k = pl.program_id(1)
    nk = pl.num_programs(1)

    @pl.when(k == 0)
    def _init():
        acc_ref[...] = jnp.zeros_like(acc_ref)

    def _fold_add(x):
        # Unrolled lane-aligned fold: (C, THW) -> (C, 128) partial sums in vregs.
        folded = x[:, 0:128]
        for i in range(1, thw // 128):
            folded = folded + x[:, i * 128:(i + 1) * 128]
        acc_ref[...] += folded

    if needs_mask:
        # Only the last HW step touches out-of-range lanes; steady-state
        # iterations run the cheaper unmasked path.
        @pl.when(k < nk - 1)
        def _steady():
            _fold_add(x_ref[...].astype(jnp.float32))

        @pl.when(k == nk - 1)
        def _tail():
            x = x_ref[...].astype(jnp.float32)
            lane = lax.broadcasted_iota(jnp.int32, x.shape, 1)
            x = jnp.where(k * thw + lane < hw_total, x, 0.0)
            _fold_add(x)
    else:
        _fold_add(x_ref[...].astype(jnp.float32))

    @pl.when(k == nk - 1)
    def _finalize():
        pooled = jnp.sum(acc_ref[...], axis=-1, keepdims=True)      # (C, 1)
        sq_sum = jnp.sum(pooled * pooled, axis=0, keepdims=True)    # (1, 1)
        o_ref[...] = (pooled * lax.rsqrt(sq_sum)).astype(o_ref.dtype)


def _vmem_budget_and_cap():
    """(VMEM budget for block sizing, lane-tile cap) for this TPU generation."""
    phys = None
    try:
        info = pltpu.get_tpu_info()
        for name in ("vmem_capacity_bytes", "vmem_bytes", "vmem_size_bytes"):
            v = getattr(info, name, None)
            if v:
                phys = int(v)
                break
    except Exception:
        phys = None
    if phys is not None and phys <= 96 * _MIB:
        # v7x-class (64 MiB per TC, ~3.2 TB/s HBM): bigger blocks amortize the
        # ~0.35us per-grid-step overhead against the much faster HBM feed.
        return 24 * _MIB, 2048
    # v5e/v6e (128 MiB physical; 16/32 MiB default scoped VMEM) or unknown.
    return 12 * _MIB, 1024


def _largest_dividing_tile(hw, limit):
    """Largest multiple of 128 that divides hw and is <= limit (0 if none)."""
    best = 0
    d = 128
    while d <= min(hw, limit):
        if hw % d == 0:
            best = d
        d += 128
    return best


def make_style(x):
    """x: (N, C, H, W) -> (N, C) global-avg-pooled, L2-normalized style vector."""
    N, C, H, W = x.shape
    HW = H * W
    itemsize = jnp.dtype(x.dtype).itemsize
    xr = x.reshape(N, C, HW)                  # free reshape: spatial -> lanes

    budget, lane_cap = _vmem_budget_and_cap()

    # Single full-extent block per batch element whenever the double-buffered
    # input block fits the budget (removes the inner grid loop entirely).
    single_block = (2 * C * HW * itemsize <= budget) or (HW < 256)

    cost = pl.CostEstimate(
        flops=2 * N * C * HW,                 # accumulate + finalize, roughly
        transcendentals=N,                    # one rsqrt per batch element
        bytes_accessed=N * C * HW * itemsize + N * C * itemsize,
    )

    if single_block:
        kernel = _style_single_block_kernel
        grid = (N,)
        in_specs = [pl.BlockSpec((pl.Squeezed(), C, HW), lambda n: (n, 0, 0))]
        out_specs = pl.BlockSpec((pl.Squeezed(), C, 1), lambda n: (n, 0, 0))
        scratch_shapes = []
        dims = ("parallel",)
        est_vmem = 2 * C * HW * itemsize + 2 * C * itemsize
    else:
        acc_bytes = C * 128 * 4
        max_lanes = max(128, ((budget - acc_bytes) // (2 * C * itemsize)) // 128 * 128)
        limit = min(lane_cap, max_lanes)
        div = _largest_dividing_tile(HW, limit)
        if div >= 512:
            thw, needs_mask = div, False      # exact tiling: mask compiles out
        else:
            thw = limit
            needs_mask = (HW % thw) != 0      # mask only on the final HW step
        n_hw = pl.cdiv(HW, thw)
        kernel = functools.partial(
            _style_tiled_kernel, hw_total=HW, thw=thw, needs_mask=needs_mask)
        grid = (N, n_hw)
        in_specs = [pl.BlockSpec((pl.Squeezed(), C, thw), lambda n, k: (n, 0, k))]
        out_specs = pl.BlockSpec((pl.Squeezed(), C, 1), lambda n, k: (n, 0, 0))
        scratch_shapes = [pltpu.VMEM((C, 128), jnp.float32)]
        dims = ("parallel", "arbitrary")
        est_vmem = 2 * C * thw * itemsize + acc_bytes + 2 * C * itemsize

    # Explicit scoped-VMEM limit sized from the real footprint (with headroom),
    # kept within every generation's physical VMEM.
    vmem_limit = int(min(32 * _MIB, max(est_vmem + 4 * _MIB, 16 * _MIB)))

    out = pl.pallas_call(
        kernel,
        out_shape=jax.ShapeDtypeStruct((N, C, 1), x.dtype),
        grid_spec=pltpu.PrefetchScalarGridSpec(
            num_scalar_prefetch=0,
            grid=grid,
            in_specs=in_specs,
            out_specs=out_specs,
            scratch_shapes=scratch_shapes,
        ),
        compiler_params=pltpu.CompilerParams(
            dimension_semantics=dims,
            vmem_limit_bytes=vmem_limit,
        ),
        cost_estimate=cost,
    )(xr)

    # TODO(synk): on v7x with N == 1 one TensorCore idles; a C-split or two-way
    # HW split with a tiny combine pass would recover the second core.
    # TODO(synk): very large C (> ~4k) would want C-tiling with a cross-tile
    # norm pass; full-C blocks keep the L2 norm local and cover typical sizes.
    return out.reshape(N, C)


def _reference(x):
    # Pure-JAX reference mirroring the PyTorch forward.
    pooled = jnp.mean(x.astype(jnp.float32), axis=(-2, -1))           # avg_pool + flatten
    style = pooled / jnp.sqrt(jnp.sum(pooled ** 2, axis=1, keepdims=True))
    return style.astype(x.dtype)


if __name__ == "__main__":
    key = jax.random.PRNGKey(0)
    k1, k2, k3, k4 = jax.random.split(key, 4)

    # 1) Module-spec small shape: single full-extent block path.
    x1 = jax.random.normal(k1, (2, 4, 16, 16), dtype=jnp.float32)
    out1 = jax.block_until_ready(make_style(x1))
    ref1 = _reference(x1)
    assert out1.shape == (2, 4), out1.shape
    assert jnp.allclose(out1, ref1, atol=1e-5, rtol=1e-5), (out1, ref1)

    # 2) Larger spatial extent, still one resident block per batch element.
    x2 = jax.random.normal(k2, (2, 8, 48, 48), dtype=jnp.float32)
    out2 = jax.block_until_ready(make_style(x2))
    ref2 = _reference(x2)
    assert out2.shape == (2, 8), out2.shape
    assert jnp.allclose(out2, ref2, atol=1e-5, rtol=1e-5), (out2, ref2)

    # 3) Large C*HW: streamed multi-tile reduction with a tile that exactly
    #    divides H*W (mask compiles out).
    x3 = jax.random.normal(k3, (1, 384, 96, 96), dtype=jnp.float32)
    out3 = jax.block_until_ready(make_style(x3))
    ref3 = _reference(x3)
    assert out3.shape == (1, 384), out3.shape
    assert jnp.allclose(out3, ref3, atol=1e-5, rtol=1e-5)

    # 4) H*W with no multiple-of-128 divisor: masked tail tile, mask gated to
    #    the final HW step only.
    x4 = jax.random.normal(k4, (1, 384, 100, 100), dtype=jnp.float32)
    out4 = jax.block_until_ready(make_style(x4))
    ref4 = _reference(x4)
    assert out4.shape == (1, 384), out4.shape
    assert jnp.allclose(out4, ref4, atol=1e-5, rtol=1e-5)

    print("KERNEL_OK")
</pallas_src>

<mosaic_0001>
module attributes {stable_mosaic.version = 11 : i64} {
  func.func @_style_single_block_kernel(%arg0: i32, %arg1: memref<1x4x256xf32, #tpu.memory_space<vmem>>, %arg2: memref<1x4x1xf32, #tpu.memory_space<vmem>>) attributes {dimension_semantics = [#tpu.dimension_semantics<parallel>], iteration_bounds = array<i64: 2>, scalar_prefetch = 0 : i64, scratch_operands = 0 : i64, tpu.core_type = #tpu.core_type<tc>, window_params = [{transform_indices = @transform_0, window_bounds = array<i64: 1, 4, 256>}, {transform_indices = @transform_1, window_bounds = array<i64: 1, 4, 1>}]} {
    %c0 = arith.constant 0 : index
    %c0_0 = arith.constant 0 : index
    %c0_1 = arith.constant 0 : index
    %0 = vector.load %arg1[%c0, %c0_0, %c0_1] : memref<1x4x256xf32, #tpu.memory_space<vmem>>, vector<1x4x256xf32>
    %1 = vector.shape_cast %0 : vector<1x4x256xf32> to vector<4x256xf32>
    %cst = arith.constant dense<0.000000e+00> : vector<4xf32>
    %2 = vector.multi_reduction <add>, %1, %cst [1] : vector<4x256xf32> to vector<4xf32>
    %3 = vector.shape_cast %2 : vector<4xf32> to vector<4x1xf32>
    %4 = arith.mulf %3, %3 : vector<4x1xf32>
    %cst_2 = arith.constant dense<0.000000e+00> : vector<1xf32>
    %5 = vector.multi_reduction <add>, %4, %cst_2 [0] : vector<4x1xf32> to vector<1xf32>
    %6 = vector.shape_cast %5 : vector<1xf32> to vector<1x1xf32>
    %7 = math.rsqrt %6 : vector<1x1xf32>
    %8 = vector.broadcast %7 : vector<1x1xf32> to vector<4x1xf32>
    %9 = arith.mulf %3, %8 : vector<4x1xf32>
    %c0_3 = arith.constant 0 : index
    %c0_4 = arith.constant 0 : index
    %c0_5 = arith.constant 0 : index
    %10 = vector.load %arg2[%c0_3, %c0_4, %c0_5] : memref<1x4x1xf32, #tpu.memory_space<vmem>>, vector<1x4x1xf32>
    %11 = vector.shape_cast %10 : vector<1x4x1xf32> to vector<4x1xf32>
    %12 = vector.shape_cast %9 : vector<4x1xf32> to vector<1x4x1xf32>
    tpu.vector_store %arg2[%c0_3, %c0_4, %c0_5], %12 {strides = array<i32>} : memref<1x4x1xf32, #tpu.memory_space<vmem>>, vector<1x4x1xf32>,
    return
  }
  func.func @transform_0(%arg0: i32) -> (i32, i32, i32) {
    %c0_i32 = arith.constant 0 : i32
    %c0_i32_0 = arith.constant 0 : i32
    %c0_i32_1 = arith.constant 0 : i32
    return %arg0, %c0_i32, %c0_i32_0 : i32, i32, i32
  }
  func.func @transform_1(%arg0: i32) -> (i32, i32, i32) {
    %c0_i32 = arith.constant 0 : i32
    %c0_i32_0 = arith.constant 0 : i32
    %c0_i32_1 = arith.constant 0 : i32
    return %arg0, %c0_i32, %c0_i32_0 : i32, i32, i32
  }
}

</mosaic_0001>

<bundles_post_ra>
// kernel: tpu_custom_call.1
= control target key start
LH: loop header
LB: loop body
LE: loop exit
PB: predicated region body
PF: predicated region fallthrough
CT: control target
= control target key end

     0   :  { %6 = vsyncpa [#allocation3], 0  ;;  %s458_s0 = inlined_call_operand.hbm [shape: f32[2,4,256], index: 0, kind: input, shape index: {}]   ;;  %s459_s1 = inlined_call_operand.vmem [shape: f32[2,4,1], index: 1, kind: output, shape index: {}]  }
   0x1   :  { %8 = vsyncpa [#allocation3 + $0x1], 0  ;;  %s351_s6 = smov 0   ;;  %s353_s7 = smov 0  }
   0x2   :  { %s355_s8 = smov 0   ;;  %s357_s9 = smov 0  }
   0x3 LB: > { %s370_s10 = sadd.s32 4294967295, %s338_s9   ;;  %s373_s11 = sadd.s32 1, %s338_s9   ;;  %s338_s9 = sphi %s357_s9, %s467_s9   ;;  %s334_s8 = sphi %s355_s8, %s466_s8   ;;  %s330_s7 = sphi %s353_s7, %s465_s7   ;;  %s326_s6 = sphi %s351_s6, %s464_s6  }
   0x4   : > { %s18_s12 = ssub.s32 %s338_s9, %s373_s11  ;;  %s21_s13 = sadd.s32 1, %s334_s8 }
   0x5   : > { %p19_p0 = scmp.eq.s32.totalorder %s18_s12, 0  ;;  %p28_p1 = scmp.ne.s32.totalorder %s334_s8, %s330_s7 }
   0x6   : > { %p29_p2 = scmp.eq.s32.totalorder %s338_s9, 0  ;;  %p34_p3 = scmp.ne.s32.totalorder %s330_s7, %s326_s6 }
   0x7   : > { %s383_s14 = scalar_select %p19_p0, %s334_s8, %s21_s13  }
   0x8   : > { %p30_p4 = por %p29_p2, %p28_p1  ;;  %p35_p5 = scmp.eq.s32.totalorder %s370_s10, 0 }
   0x9   : > { %p238_p6 = scmp.lt.s32.totalorder %s338_s9, 2  ;;  %s84_s16 = sand.u32 1, %s334_s8  }
   0xa   : > { %p387_p7 = por %p35_p5, %p34_p3  ;;  %s223_s17 = sshll.u32 %s84_s16, 3 }
   0xb   : > { %s231_s18 = sshll.u32 %s338_s9, 7  ;;  %s88_s22 = scalar_lea.vmem [#allocation2], %s223_s17 }
   0xc   : > { %s396_s21 = scalar_lea.hbm %s458_s0, %s231_s18  ;;  %s96_s23 = sshll.u32 %s88_s22, 4  ;;  %s398_s23 = int_to_ptr.vmem [resolvable:$true] %s96_s23 }
   0xd   : > { %p400_p8 = pnand %p238_p6, %p30_p4  ;;  %s85_s25 = scalar_lea.sflag [#allocation3], %s84_s16 }
   0xe   : > { %s274_s26 = scalar_lea.hbm %s396_s21, 128  ;;  %s279_s29 = scalar_lea.hbm %s458_s0, 256 }
   0xf   : > { %p275_p11 = scmp.ne.s32.totalorder %s396_s21, %s274_s26  ;;  %p276_p12 = pneg %p400_p8 }
  0x10   : > { %p280_p1 = scmp.lt.u32.totalorder %s396_s21, %s458_s0  ;;  %p281_p2 = scmp.lt.u32.totalorder %s279_s29, %s274_s26 }
  0x11   : > { %p277_p13 = pnand %p276_p12, %p275_p11  ;;  %p283_p4 = scmp.lt.u32.totalorder %s274_s26, %s396_s21 }
  0x12   : > { %p282_p3 = por %p281_p2, %p280_p1 }
  0x13   : > { %p278_p0 = pneg %p277_p13 }
  0x14   : > { %p284_p5 = por %p283_p4, %p282_p3 }
  0x16   : > { %p285_p6 = pnand %p284_p5, %p278_p0 }
  0x18   : > { %288 = shalt.err (!%p285_p6)
}
  0x19   : > { %s289_s3 = scalar_lea.vmem %s398_s23, 128  ;;  %s340_s4 = smov [#allocation2]  }
  0x1a   : > { %p290_p11 = scmp.ne.s32.totalorder %s398_s23, %s289_s3  ;;  %s294_s5 = sshll.u32 %s340_s4, 4  ;;  %s295_s5 = int_to_ptr.vmem [resolvable:$false] %s294_s5 }
  0x1b   : > { %s296_s6 = scalar_lea.vmem %s295_s5, 256  ;;  %p297_p10 = scmp.lt.s32.totalorder %s398_s23, %s295_s5 }
  0x1c   : > { %p292_p13 = pnand %p290_p11, %p276_p12  ;;  %p298_p1 = scmp.lt.s32.totalorder %s296_s6, %s289_s3 }
  0x1e   : > { %p293_p9 = pneg %p292_p13  ;;  %p299_p2 = por %p298_p1, %p297_p10 }
  0x20   : > { %p300_p3 = pnand %p299_p2, %p293_p9 }
  0x22   : > { %303 = shalt.err (!%p300_p3)
}
  0x23   : > { %237 = dma.hbm_to_vmem [thread:$0]  (!%p400_p8), %s396_s21, 128, %s398_s23, %s85_s25  }
  0x24   : > { %p462_p0 = scmp.lt.s32.totalorder %s338_s9, 3  ;;  %p463_p4 = scmp.ge.s32.totalorder %s338_s9, 1 }
  0x26   : > { %p102_p12 = pnand %p463_p4, %p462_p0 }
  0x27   : > { %s107_s12 = sand.u32 (!%p102_p12), 1, %s330_s7  }
  0x28   : > { %105 = sbr.rel (%p102_p12) target bundleno = 225 (0xe1), region = 24  ;;  %s227_s13 = sshll.u32 (!%p102_p12), %s107_s12, 3 }
  0x29   : > { %s108_s16 = scalar_lea.sflag (!%p102_p12), [#allocation3], %s107_s12  ;;  %s111_s17 = scalar_lea.vmem (!%p102_p12), [#allocation2], %s227_s13 }
  0x2f   : > { %321 = dma.done.wait (%p387_p7), %s108_s16, 128  }
  0x30   : > { %323 = vsyncadd (%p387_p7), %s108_s16, 4294967168  ;;  %vm137_vm0 = vcmask 1043456   ;;  %v133_v0 = vld [vmem:[%s111_s17] sm:$0xff]  ;;  %p129_p8 = scmp.lt.s32.totalorder %s370_s10, 1  ;;  %vm153_vm1 = vcmask 3072  }
  0x31   : > { %v135_v1 = vcombine.high %v133_v0, %v133_v0  ;;  %v138_v2 = vsel %vm137_vm0, %v133_v0, 0.0 }
  0x32   : > { %s469_s10 = smov (!%p129_p8, %s370_s10), 1 }
  0x33   : > { %v139_v3 = vsel %vm137_vm0, %v135_v1, 0.0  ;;  %s228_s9 = sshll.u32 %s469_s10, 2 }
  0x34   : > { %v140_v4 = vadd.f32 %v139_v3, %v138_v2  ;;  %s132_s19 = scalar_lea.vmem %s459_s1, %s228_s9 }
  0x36   : > { %141 = vadd.xlane.f32.xlu0 %v140_v4 }
  0xc3   : > { %v142_v5 = vpop.xlane.xlu0 %141 }
  0xc4   : > { %v143_v6 = vmul.f32 %v142_v5, %v142_v5 }
  0xc6   : > { %v144_v7 = vsel %vm137_vm0, %v143_v6, 0.0 }
  0xc7   : > { %v145_v8 = vrot.slane %v144_v7, 4 }
  0xc9   : > { %v146_v9 = vadd.f32 %v145_v8, %v144_v7 }
  0xcb   : > { %v147_v10 = vrot.slane %v146_v9, 2 }
  0xcd   : > { %v148_v11 = vadd.f32 %v147_v10, %v146_v9 }
  0xcf   : > { %v149_v12 = vrot.slane %v148_v11, 1 }
  0xd1   : > { %v150_v13 = vadd.f32 %v149_v12, %v148_v11 }
  0xd3   : > { %272 = vrsqrt.f32 %v150_v13 }
  0xdd   : > { %v273_v14 = vpop.eup %272 }
  0xde   : > { %v152_v15 = vmul.f32 %v273_v14, %v142_v5 }
  0xe0   : > { %154 = vst.msk [vmem:[%s132_s19] sm:$0xf] %vm153_vm1, %v152_v15 }
  0xe1 PF: > { %p11_p7 = scmp.ge.s32.totalorder %s373_s11, 4   ;;  %s464_s6 = smov %s330_s7 }
  0xe2   : > { %s465_s7 = smov %s334_s8  ;;  %s466_s8 = smov %s383_s14 }
  0xe3   : > { %s467_s9 = smov %s373_s11  ;;  %13 = sbr.rel (!%p11_p7) target bundleno = 3 (0x3), region = 64 }
  0xea   :  { %174 = vsyncpa [#allocation3], 1 }
  0xeb   :  { %176 = vsyncpa [#allocation3 + $0x1], 1 }

</bundles_post_ra>
